<compile_context>
chip_gen: v7x
topology: tpu7x:2x2x1
jax: 0.10.0
libtpu: 0.0.40
codegen_flags: <defaults>
</compile_context>

<pallas_src>
import jax
import jax.numpy as jnp
from jax.experimental import pallas as pl
from jax.experimental.pallas import tpu as pltpu


def _locked_dropout_kernel(x_ref, m_ref, o_ref):
    # (block_t, block_f) * (1, block_f) -> implicit broadcast, pure VPU work.
    o_ref[...] = x_ref[...] * m_ref[...]


_TARGET_BLOCK_BYTES = 2 * 1024 * 1024  # per in/out block (double-buffered by Pallas)


def _choose_blocks(T, F, itemsize):
    """Pick (block_t, block_f) satisfying the (8, 128) tiling constraint."""
    # Feature (lane) axis: full axis if not a 128-multiple, else a lane-dense
    # 128-multiple slab.
    if F % 128 != 0:
        block_f = F
    else:
        block_f = min(F, 4096)
    # Time (sublane) axis: largest 8-multiple keeping the block near the byte
    # target; fall back to the full axis when T is small.
    max_t = max(1, _TARGET_BLOCK_BYTES // max(1, block_f * itemsize))
    if T <= max_t or T <= 8:
        block_t = T
    else:
        block_t = max(8, (min(T, max_t) // 8) * 8)
    return block_t, block_f


def locked_dropout(x, dropout_rate, key, *, training=True):
    """Pallas LockedDropout forward.

    x: (T, B, H) array.  Returns x unchanged if not training or rate == 0,
    mirroring the PyTorch module.
    """
    if (not training) or (not dropout_rate):
        return x
    if not (0.0 <= float(dropout_rate) < 1.0):
        raise ValueError("dropout_rate must be in [0, 1)")

    T, B, H = x.shape
    F = B * H
    scale = 1.0 / (1.0 - float(dropout_rate))

    # One locked mask of shape (1, F), already in x.dtype (no per-step casts).
    keep = jax.random.bernoulli(key, 1.0 - float(dropout_rate), (1, F))
    mask = jnp.where(keep, scale, 0.0).astype(x.dtype)

    x2 = x.reshape(T, F)
    block_t, block_f = _choose_blocks(T, F, x.dtype.itemsize)
    grid = (pl.cdiv(T, block_t), pl.cdiv(F, block_f))

    out = pl.pallas_call(
        _locked_dropout_kernel,
        out_shape=jax.ShapeDtypeStruct((T, F), x.dtype),
        grid=grid,
        in_specs=[
            pl.BlockSpec((block_t, block_f), lambda t, f: (t, f)),
            pl.BlockSpec((1, block_f), lambda t, f: (0, f)),
        ],
        out_specs=pl.BlockSpec((block_t, block_f), lambda t, f: (t, f)),
        compiler_params=pltpu.CompilerParams(
            # No cross-step state: both axes are independent -> megacore OK.
            dimension_semantics=("parallel", "parallel"),
        ),
    )(x2, mask)

    return out.reshape(T, B, H)


if __name__ == "__main__":
    T, B, H = 8, 4, 32          # F = B*H = 128 -> exactly lane-dense
    rate = 0.5

    root = jax.random.PRNGKey(0)
    kx, km = jax.random.split(root)
    x = jax.random.normal(kx, (T, B, H), dtype=jnp.float32)

    out = locked_dropout(x, rate, km, training=True)
    out = jax.block_until_ready(out)

    # --- sanity checks on LockedDropout semantics ---
    scale = 1.0 / (1.0 - rate)
    ratio = out / x                                   # x ~ N(0,1), never exactly 0 here
    # 1) every element is either dropped (0) or scaled by exactly 1/(1-p)
    ok_vals = bool(
        jnp.all((jnp.abs(ratio) < 1e-5) | (jnp.abs(ratio - scale) < 1e-4))
    )
    # 2) the mask is "locked": identical across the time axis
    ok_locked = bool(jnp.all(jnp.abs(ratio - ratio[0:1]) < 1e-4))
    # 3) eval mode / zero rate is identity
    ok_eval = bool(jnp.all(locked_dropout(x, rate, km, training=False) == x))
    ok_zero = bool(jnp.all(locked_dropout(x, 0.0, km, training=True) == x))

    assert out.shape == x.shape and out.dtype == x.dtype
    assert ok_vals and ok_locked and ok_eval and ok_zero

    print("KERNEL_OK")
</pallas_src>

<mosaic_0001>
module attributes {stable_mosaic.version = 11 : i64} {
  func.func @_locked_dropout_kernel(%arg0: i32, %arg1: i32, %arg2: memref<8x128xf32, #tpu.memory_space<vmem>>, %arg3: memref<1x128xf32, #tpu.memory_space<vmem>>, %arg4: memref<8x128xf32, #tpu.memory_space<vmem>>) attributes {dimension_semantics = [#tpu.dimension_semantics<parallel>, #tpu.dimension_semantics<parallel>], iteration_bounds = array<i64: 1, 1>, scalar_prefetch = 0 : i64, scratch_operands = 0 : i64, tpu.core_type = #tpu.core_type<tc>, window_params = [{transform_indices = @transform_0, window_bounds = array<i64: 8, 128>}, {transform_indices = @transform_1, window_bounds = array<i64: 1, 128>}, {transform_indices = @transform_2, window_bounds = array<i64: 8, 128>}]} {
    %c0 = arith.constant 0 : index
    %c0_0 = arith.constant 0 : index
    %0 = vector.load %arg2[%c0, %c0_0] : memref<8x128xf32, #tpu.memory_space<vmem>>, vector<8x128xf32>
    %c0_1 = arith.constant 0 : index
    %c0_2 = arith.constant 0 : index
    %1 = vector.load %arg3[%c0_1, %c0_2] : memref<1x128xf32, #tpu.memory_space<vmem>>, vector<1x128xf32>
    %2 = vector.broadcast %1 : vector<1x128xf32> to vector<8x128xf32>
    %3 = arith.mulf %0, %2 : vector<8x128xf32>
    %c0_3 = arith.constant 0 : index
    %c0_4 = arith.constant 0 : index
    %4 = vector.load %arg4[%c0_3, %c0_4] : memref<8x128xf32, #tpu.memory_space<vmem>>, vector<8x128xf32>
    tpu.vector_store %arg4[%c0_3, %c0_4], %3 {strides = array<i32>} : memref<8x128xf32, #tpu.memory_space<vmem>>, vector<8x128xf32>,
    return
  }
  func.func @transform_0(%arg0: i32, %arg1: i32) -> (i32, i32) {
    %c0_i32 = arith.constant 0 : i32
    return %arg0, %arg1 : i32, i32
  }
  func.func @transform_1(%arg0: i32, %arg1: i32) -> (i32, i32) {
    %c0_i32 = arith.constant 0 : i32
    %c0_i32_0 = arith.constant 0 : i32
    return %c0_i32, %arg1 : i32, i32
  }
  func.func @transform_2(%arg0: i32, %arg1: i32) -> (i32, i32) {
    %c0_i32 = arith.constant 0 : i32
    return %arg0, %arg1 : i32, i32
  }
}

</mosaic_0001>

<bundles_post_ra>
// kernel: tpu_custom_call.1
= control target key start
LH: loop header
LB: loop body
LE: loop exit
PB: predicated region body
PF: predicated region fallthrough
CT: control target
= control target key end

     0   :  { %7 = vsyncpa [#allocation3], 0  ;;  %s144_s0 = inlined_call_operand.hbm [shape: f32[8,128], index: 0, kind: input, shape index: {}]   ;;  %s145_s1 = inlined_call_operand.vmem [shape: f32[1,128], index: 1, kind: input, shape index: {}]   ;;  %s146_s2 = inlined_call_operand.hbm [shape: f32[8,128], index: 2, kind: output, shape index: {}]  }
   0x1   :  { %8 = vsyncpa [#allocation4], 0  ;;  %s100_s9 = smov [#allocation2]   ;;  %s52_s13 = scalar_lea.hbm %s144_s0, 128 }
   0x2   :  { %s15_s10 = sshll.u32 %s100_s9, 4  ;;  %p53_p0 = scmp.ne.s32.totalorder %s144_s0, %s52_s13  ;;  %s16_s10 = int_to_ptr.vmem [resolvable:$true] %s15_s10 }
   0x3   :  { %p56_p1 = scmp.lt.u32.totalorder %s52_s13, %s144_s0 }
   0x5   :  { %p58_p2 = pnand %p56_p1, %p53_p0 }
   0x7   :  { %61 = shalt.err (!%p58_p2)
}
   0x8   :  { %s62_s18 = scalar_lea.vmem %s16_s10, 128  ;;  %p67_p4 = scmp.lt.s32.totalorder %s16_s10, %s16_s10 }
   0x9   :  { %p63_p3 = scmp.ne.s32.totalorder %s16_s10, %s62_s18  ;;  %p68_p5 = scmp.lt.s32.totalorder %s62_s18, %s62_s18 }
   0xb   :  { %p69_p6 = por %p68_p5, %p67_p4 }
   0xd   :  { %p70_p7 = pnand %p69_p6, %p63_p3 }
   0xf   :  { %73 = shalt.err (!%p70_p7)
}
  0x10   :  { %18 = dma.hbm_to_vmem [thread:$0]  %s144_s0, 128, %s16_s10, [#allocation3]  }
  0x11   :  { %96 = dma.done.wait [#allocation3], 128  }
  0x12   :  { %97 = vsyncadd [#allocation3], 4294967168  ;;  %s101_s21 = smov [#allocation5]   ;;  %v24_v0 = vld [vmem:[#allocation2] sm:$0xff] }
  0x13   :  { %s40_s22 = sshll.u32 %s101_s21, 4  ;;  %v49_v1 = vld [vmem:[%s145_s1] ss:$0 sm:$0xff]  ;;  %s41_s22 = int_to_ptr.vmem [resolvable:$true] %s40_s22 }
  0x14   :  { %v32_v2 = vmul.f32 %v49_v1, %v24_v0  ;;  %s74_s25 = scalar_lea.vmem %s41_s22, 128  ;;  %p79_p9 = scmp.lt.s32.totalorder %s41_s22, %s41_s22 }
  0x15   :  { %p75_p8 = scmp.ne.s32.totalorder %s41_s22, %s74_s25  ;;  %p80_p10 = scmp.lt.s32.totalorder %s74_s25, %s74_s25 }
  0x16   :  { %33 = vst [vmem:[#allocation5] sm:$0xff] %v32_v2 }
  0x17   :  { %p81_p11 = por %p80_p10, %p79_p9 }
  0x19   :  { %p82_p12 = pnand %p81_p11, %p75_p8 }
  0x1b   :  { %85 = shalt.err (!%p82_p12)
}
  0x1c   :  { %s86_s27 = scalar_lea.hbm %s146_s2, 128 }
  0x1d   :  { %p87_p13 = scmp.ne.s32.totalorder %s146_s2, %s86_s27  ;;  %p90_p0 = scmp.lt.u32.totalorder %s86_s27, %s146_s2 }
  0x1f   :  { %p92_p1 = pnand %p90_p0, %p87_p13 }
  0x21   :  { %95 = shalt.err (!%p92_p1)
}
  0x22   :  { %43 = dma.vmem_to_hbm [thread:$0]  %s41_s22, 128, %s146_s2, [#allocation4]  }
  0x23   :  { %98 = dma.done.wait [#allocation4], 128  }
  0x24   :  { %99 = vsyncadd [#allocation4], 4294967168 }
  0x25   :  { %47 = vsyncpa [#allocation3], 1 }
  0x26   :  { %48 = vsyncpa [#allocation4], 1 }

</bundles_post_ra>
